<compile_context>
chip_gen: v7x
topology: tpu7x:2x2x1
jax: 0.10.0
libtpu: 0.0.40
codegen_flags: <defaults>
</compile_context>

<pallas_src>
import jax
import jax.numpy as jnp
from jax.experimental import pallas as pl
from jax.experimental.pallas import tpu as pltpu


# ----------------------------- Pallas kernel -------------------------------

def _hardswish(y):
    # HardSwish from the module: relu6(y + 3) / 6 * y   (done in f32)
    return jnp.clip(y + 3.0, 0.0, 6.0) * (1.0 / 6.0) * y


def critic_kernel(x_ref, w0_ref, b0_ref, w1_ref, b1_ref,
                  w2h_ref, w2d_ref, b2_ref,
                  w3h_ref, w3d1_ref, w3d2_ref, b3_ref, q_ref):
    x = x_ref[...]                                            # [TB, S] (bf16/f32)

    # net[0] + net[1]: Linear(S -> M) + ReLU, f32 accumulation on the MXU.
    h0 = jnp.dot(x, w0_ref[...], preferred_element_type=jnp.float32) + b0_ref[...]
    h0 = jnp.maximum(h0, 0.0)                                 # f32 [TB, M]
    h0_c = h0.astype(w1_ref.dtype)

    # DenseNet.dense1: Linear(M -> M) + HardSwish.
    d1 = _hardswish(jnp.dot(h0_c, w1_ref[...],
                            preferred_element_type=jnp.float32) + b1_ref[...])
    d1_c = d1.astype(w2h_ref.dtype)                           # f32 -> compute dtype

    # DenseNet.dense2 on cat(h0, d1): split GEMM instead of a lane-axis concat.
    y2 = (jnp.dot(h0_c, w2h_ref[...], preferred_element_type=jnp.float32)
          + jnp.dot(d1_c, w2d_ref[...], preferred_element_type=jnp.float32)
          + b2_ref[...])
    d2 = _hardswish(y2)                                       # f32 [TB, 2M]

    # net[3]: Linear(4M -> 1) on cat(h0, d1, d2).  Done as broadcast multiply +
    # lane reduction (VPU/XLU) — avoids both the concat and an N=1 MXU matmul.
    q = (jnp.sum(h0 * w3h_ref[...], axis=-1, keepdims=True)
         + jnp.sum(d1 * w3d1_ref[...], axis=-1, keepdims=True)
         + jnp.sum(d2 * w3d2_ref[...], axis=-1, keepdims=True)
         + b3_ref[...])
    q_ref[...] = q.astype(q_ref.dtype)                        # [TB, 1]


# ------------------------------ wrapper -------------------------------------

def critic_forward(s, params, *, block_b=512, compute_dtype=jnp.bfloat16):
    """Pallas forward pass. params = (w0, b0, w1, b1, w2, b2, w3, b3), weights
    stored as (in, out).  `block_b` is the batch tile; weights stay resident in
    VMEM across the batch grid.  For best MXU/lane utilization pick mid_dim as
    a multiple of 128 in real configs (toy sizes below are just for the test).
    """
    w0, b0, w1, b1, w2, b2, w3, b3 = params
    B, S = s.shape
    M = w0.shape[1]

    # Split concat-consuming weights in the wrapper (pure slicing, no copies in
    # the kernel): x2 @ W2 == h0 @ W2[:M] + d1 @ W2[M:];  x3 @ W3 split 3 ways.
    w2h, w2d = w2[:M], w2[M:]                                 # (M, 2M), (M, 2M)
    w3h = w3[:M].reshape(1, M)
    w3d1 = w3[M:2 * M].reshape(1, M)
    w3d2 = w3[2 * M:].reshape(1, 2 * M)

    # bf16 (or f32) operands for the MXU; biases and the final-layer row
    # vectors stay f32 for the elementwise / reduction path.
    x = s.astype(compute_dtype)
    w0c, w1c, w2hc, w2dc = (w.astype(compute_dtype) for w in (w0, w1, w2h, w2d))
    b0f, b1f, b2f, b3f = (b.astype(jnp.float32) for b in (b0, b1, b2, b3))
    w3hf, w3d1f, w3d2f = (w.astype(jnp.float32) for w in (w3h, w3d1, w3d2))

    # Batch tile: multiple of the sublane packing (16 for 16-bit, 8 for 32-bit).
    min_sub = 16 if jnp.dtype(compute_dtype).itemsize == 2 else 8
    TB = max(min_sub, min(int(block_b), B))
    TB = (TB // min_sub) * min_sub
    B_pad = -(-B // TB) * TB
    if B_pad != B:
        x = jnp.pad(x, ((0, B_pad - B), (0, 0)))
    grid = (B_pad // TB,)

    consts = (w0c, b0f, w1c, b1f, w2hc, w2dc, b2f, w3hf, w3d1f, w3d2f, b3f)
    in_specs = [pl.BlockSpec((TB, S), lambda i: (i, 0))]      # batch-tiled input
    in_specs += [pl.BlockSpec(c.shape, lambda i: (0, 0)) for c in consts]
    out_specs = pl.BlockSpec((TB, 1), lambda i: (i, 0))

    # Explicit scoped-VMEM budget: resident weights + double-buffered IO tiles
    # + generous f32 activation scratch, with headroom (kept under v7x's 64MiB).
    nbytes = lambda a: a.size * a.dtype.itemsize
    weight_bytes = sum(nbytes(c) for c in consts)
    io_bytes = 2 * TB * S * jnp.dtype(compute_dtype).itemsize + 2 * TB * 4
    act_bytes = 8 * TB * 4 * M * 4
    vmem_limit = int(1.5 * (weight_bytes + io_bytes + act_bytes)) + (2 << 20)
    vmem_limit = min(max(vmem_limit, 16 << 20), 48 << 20)

    q = pl.pallas_call(
        critic_kernel,
        out_shape=jax.ShapeDtypeStruct((B_pad, 1), jnp.float32),
        grid=grid,
        in_specs=in_specs,
        out_specs=out_specs,
        compiler_params=pltpu.CompilerParams(
            dimension_semantics=("parallel",),
            vmem_limit_bytes=vmem_limit),
    )(x, *consts)
    return q[:B]


# --------------------------- parameter init ----------------------------------

def _orthogonal(key, rows, cols, gain=1.0):
    # Deterministic orthogonal init (mirrors torch.nn.init.orthogonal_ semantics).
    n = max(rows, cols)
    a = jax.random.normal(key, (n, n), dtype=jnp.float32)
    q, r = jnp.linalg.qr(a)
    q = q * jnp.sign(jnp.diag(r))[None, :]
    return gain * q[:rows, :cols]


def make_critic_params(key, state_dim, mid_dim):
    k0, k1, k2, k3 = jax.random.split(key, 4)
    # stored as (in, out) == PyTorch weight.T ; init values are synthetic.
    w0 = _orthogonal(k0, state_dim, mid_dim, gain=1.0)
    b0 = jnp.zeros((1, mid_dim), jnp.float32)
    w1 = _orthogonal(k1, mid_dim, mid_dim, gain=1.0)           # dense1 (std=1)
    b1 = jnp.zeros((1, mid_dim), jnp.float32)
    w2 = _orthogonal(k2, 2 * mid_dim, 2 * mid_dim, gain=1.0)   # dense2 (std=1)
    b2 = jnp.zeros((1, 2 * mid_dim), jnp.float32)
    bound = 1.0 / jnp.sqrt(4.0 * mid_dim)                      # net[-1] default-ish
    w3 = jax.random.uniform(k3, (4 * mid_dim, 1), jnp.float32, -bound, bound)
    b3 = jnp.zeros((1, 1), jnp.float32)
    return (w0, b0, w1, b1, w2, b2, w3, b3)


# pure-JAX f32 reference for a sanity check
def critic_ref(s, params):
    w0, b0, w1, b1, w2, b2, w3, b3 = params
    h0 = jnp.maximum(s @ w0 + b0, 0.0)
    d1 = _hardswish(h0 @ w1 + b1)
    x2 = jnp.concatenate([h0, d1], axis=1)
    d2 = _hardswish(x2 @ w2 + b2)
    x3 = jnp.concatenate([x2, d2], axis=1)
    return x3 @ w3 + b3


# --------------------------------- main --------------------------------------

if __name__ == "__main__":
    # Small test shapes.  NOTE: at sizes this small the Pallas call is pure
    # launch/DMA overhead and plain XLA fusion would win; the tiling/grid only
    # pays off at realistic B (thousands) and 128-aligned mid_dim.
    B, STATE_DIM, MID_DIM = 32, 24, 32

    key = jax.random.PRNGKey(0)
    k_s, k_p = jax.random.split(key, 2)
    s = jax.random.normal(k_s, (B, STATE_DIM), dtype=jnp.float32)
    params = make_critic_params(k_p, STATE_DIM, MID_DIM)

    # block_b=16 forces a 2-step batch grid even at this toy batch size.
    q = critic_forward(s, params, block_b=16)
    q = jax.block_until_ready(q)

    q_ref = critic_ref(s, params)
    assert q.shape == (B, 1)
    # bf16 operands with f32 accumulation -> loose tolerance vs the f32 reference
    max_err = float(jnp.max(jnp.abs(q - q_ref)))
    assert jnp.allclose(q, q_ref, atol=5e-2, rtol=5e-2), \
        f"mismatch vs reference (max abs err {max_err})"

    print("KERNEL_OK")
</pallas_src>

<mosaic_0001>
module attributes {stable_mosaic.version = 11 : i64} {
  func.func @critic_kernel(%arg0: i32, %arg1: memref<16x24xbf16, #tpu.memory_space<vmem>>, %arg2: memref<24x32xbf16, #tpu.memory_space<vmem>>, %arg3: memref<1x32xf32, #tpu.memory_space<vmem>>, %arg4: memref<32x32xbf16, #tpu.memory_space<vmem>>, %arg5: memref<1x32xf32, #tpu.memory_space<vmem>>, %arg6: memref<32x64xbf16, #tpu.memory_space<vmem>>, %arg7: memref<32x64xbf16, #tpu.memory_space<vmem>>, %arg8: memref<1x64xf32, #tpu.memory_space<vmem>>, %arg9: memref<1x32xf32, #tpu.memory_space<vmem>>, %arg10: memref<1x32xf32, #tpu.memory_space<vmem>>, %arg11: memref<1x64xf32, #tpu.memory_space<vmem>>, %arg12: memref<1x1xf32, #tpu.memory_space<vmem>>, %arg13: memref<16x1xf32, #tpu.memory_space<vmem>>) attributes {dimension_semantics = [#tpu.dimension_semantics<parallel>], iteration_bounds = array<i64: 2>, scalar_prefetch = 0 : i64, scratch_operands = 0 : i64, tpu.core_type = #tpu.core_type<tc>, window_params = [{transform_indices = @transform_0, window_bounds = array<i64: 16, 24>}, {pipeline_mode = #tpu.pipeline_mode<synchronous>, transform_indices = @transform_1, window_bounds = array<i64: 24, 32>}, {pipeline_mode = #tpu.pipeline_mode<synchronous>, transform_indices = @transform_2, window_bounds = array<i64: 1, 32>}, {pipeline_mode = #tpu.pipeline_mode<synchronous>, transform_indices = @transform_3, window_bounds = array<i64: 32, 32>}, {pipeline_mode = #tpu.pipeline_mode<synchronous>, transform_indices = @transform_4, window_bounds = array<i64: 1, 32>}, {pipeline_mode = #tpu.pipeline_mode<synchronous>, transform_indices = @transform_5, window_bounds = array<i64: 32, 64>}, {pipeline_mode = #tpu.pipeline_mode<synchronous>, transform_indices = @transform_6, window_bounds = array<i64: 32, 64>}, {pipeline_mode = #tpu.pipeline_mode<synchronous>, transform_indices = @transform_7, window_bounds = array<i64: 1, 64>}, {pipeline_mode = #tpu.pipeline_mode<synchronous>, transform_indices = @transform_8, window_bounds = array<i64: 1, 32>}, {pipeline_mode = #tpu.pipeline_mode<synchronous>, transform_indices = @transform_9, window_bounds = array<i64: 1, 32>}, {pipeline_mode = #tpu.pipeline_mode<synchronous>, transform_indices = @transform_10, window_bounds = array<i64: 1, 64>}, {pipeline_mode = #tpu.pipeline_mode<synchronous>, transform_indices = @transform_11, window_bounds = array<i64: 1, 1>}, {transform_indices = @transform_12, window_bounds = array<i64: 16, 1>}]} {
    %c0 = arith.constant 0 : index
    %c0_0 = arith.constant 0 : index
    %0 = vector.load %arg1[%c0, %c0_0] : memref<16x24xbf16, #tpu.memory_space<vmem>>, vector<16x24xbf16>
    %c0_1 = arith.constant 0 : index
    %c0_2 = arith.constant 0 : index
    %1 = vector.load %arg2[%c0_1, %c0_2] : memref<24x32xbf16, #tpu.memory_space<vmem>>, vector<24x32xbf16>
    %cst = arith.constant dense<0.000000e+00> : vector<16x32xf32>
    %2 = tpu.matmul %0, %1, %cst {dimension_numbers = #tpu.dot_dimension_numbers<[1], [0], [0], [1], [0, 0, 1, 1], [], []>} : vector<16x24xbf16>, vector<24x32xbf16>, vector<16x32xf32> -> vector<16x32xf32>
    %c0_3 = arith.constant 0 : index
    %c0_4 = arith.constant 0 : index
    %3 = vector.load %arg3[%c0_3, %c0_4] : memref<1x32xf32, #tpu.memory_space<vmem>>, vector<1x32xf32>
    %4 = vector.broadcast %3 : vector<1x32xf32> to vector<16x32xf32>
    %5 = arith.addf %2, %4 : vector<16x32xf32>
    %cst_5 = arith.constant 0.000000e+00 : f32
    %6 = vector.broadcast %cst_5 : f32 to vector<16x32xf32>
    %7 = arith.maximumf %5, %6 : vector<16x32xf32>
    %8 = arith.truncf %7 : vector<16x32xf32> to vector<16x32xbf16>
    %c0_6 = arith.constant 0 : index
    %c0_7 = arith.constant 0 : index
    %9 = vector.load %arg4[%c0_6, %c0_7] : memref<32x32xbf16, #tpu.memory_space<vmem>>, vector<32x32xbf16>
    %cst_8 = arith.constant dense<0.000000e+00> : vector<16x32xf32>
    %10 = tpu.matmul %8, %9, %cst_8 {dimension_numbers = #tpu.dot_dimension_numbers<[1], [0], [0], [1], [0, 0, 1, 1], [], []>} : vector<16x32xbf16>, vector<32x32xbf16>, vector<16x32xf32> -> vector<16x32xf32>
    %c0_9 = arith.constant 0 : index
    %c0_10 = arith.constant 0 : index
    %11 = vector.load %arg5[%c0_9, %c0_10] : memref<1x32xf32, #tpu.memory_space<vmem>>, vector<1x32xf32>
    %12 = vector.broadcast %11 : vector<1x32xf32> to vector<16x32xf32>
    %13 = arith.addf %10, %12 : vector<16x32xf32>
    %cst_11 = arith.constant 3.000000e+00 : f32
    %14 = vector.broadcast %cst_11 : f32 to vector<16x32xf32>
    %15 = arith.addf %13, %14 : vector<16x32xf32>
    %cst_12 = arith.constant 0.000000e+00 : f32
    %cst_13 = arith.constant 6.000000e+00 : f32
    %16 = vector.broadcast %cst_12 : f32 to vector<16x32xf32>
    %17 = arith.maximumf %16, %15 : vector<16x32xf32>
    %18 = vector.broadcast %cst_13 : f32 to vector<16x32xf32>
    %19 = arith.minimumf %18, %17 : vector<16x32xf32>
    %cst_14 = arith.constant 0.166666672 : f32
    %20 = vector.broadcast %cst_14 : f32 to vector<16x32xf32>
    %21 = arith.mulf %19, %20 : vector<16x32xf32>
    %22 = arith.mulf %21, %13 : vector<16x32xf32>
    %23 = arith.truncf %22 : vector<16x32xf32> to vector<16x32xbf16>
    %c0_15 = arith.constant 0 : index
    %c0_16 = arith.constant 0 : index
    %24 = vector.load %arg6[%c0_15, %c0_16] : memref<32x64xbf16, #tpu.memory_space<vmem>>, vector<32x64xbf16>
    %cst_17 = arith.constant dense<0.000000e+00> : vector<16x64xf32>
    %25 = tpu.matmul %8, %24, %cst_17 {dimension_numbers = #tpu.dot_dimension_numbers<[1], [0], [0], [1], [0, 0, 1, 1], [], []>} : vector<16x32xbf16>, vector<32x64xbf16>, vector<16x64xf32> -> vector<16x64xf32>
    %c0_18 = arith.constant 0 : index
    %c0_19 = arith.constant 0 : index
    %26 = vector.load %arg7[%c0_18, %c0_19] : memref<32x64xbf16, #tpu.memory_space<vmem>>, vector<32x64xbf16>
    %cst_20 = arith.constant dense<0.000000e+00> : vector<16x64xf32>
    %27 = tpu.matmul %23, %26, %cst_20 {dimension_numbers = #tpu.dot_dimension_numbers<[1], [0], [0], [1], [0, 0, 1, 1], [], []>} : vector<16x32xbf16>, vector<32x64xbf16>, vector<16x64xf32> -> vector<16x64xf32>
    %28 = arith.addf %25, %27 : vector<16x64xf32>
    %c0_21 = arith.constant 0 : index
    %c0_22 = arith.constant 0 : index
    %29 = vector.load %arg8[%c0_21, %c0_22] : memref<1x64xf32, #tpu.memory_space<vmem>>, vector<1x64xf32>
    %30 = vector.broadcast %29 : vector<1x64xf32> to vector<16x64xf32>
    %31 = arith.addf %28, %30 : vector<16x64xf32>
    %cst_23 = arith.constant 3.000000e+00 : f32
    %32 = vector.broadcast %cst_23 : f32 to vector<16x64xf32>
    %33 = arith.addf %31, %32 : vector<16x64xf32>
    %cst_24 = arith.constant 0.000000e+00 : f32
    %cst_25 = arith.constant 6.000000e+00 : f32
    %34 = vector.broadcast %cst_24 : f32 to vector<16x64xf32>
    %35 = arith.maximumf %34, %33 : vector<16x64xf32>
    %36 = vector.broadcast %cst_25 : f32 to vector<16x64xf32>
    %37 = arith.minimumf %36, %35 : vector<16x64xf32>
    %cst_26 = arith.constant 0.166666672 : f32
    %38 = vector.broadcast %cst_26 : f32 to vector<16x64xf32>
    %39 = arith.mulf %37, %38 : vector<16x64xf32>
    %40 = arith.mulf %39, %31 : vector<16x64xf32>
    %c0_27 = arith.constant 0 : index
    %c0_28 = arith.constant 0 : index
    %41 = vector.load %arg9[%c0_27, %c0_28] : memref<1x32xf32, #tpu.memory_space<vmem>>, vector<1x32xf32>
    %42 = vector.broadcast %41 : vector<1x32xf32> to vector<16x32xf32>
    %43 = arith.mulf %7, %42 : vector<16x32xf32>
    %cst_29 = arith.constant dense<0.000000e+00> : vector<16xf32>
    %44 = vector.multi_reduction <add>, %43, %cst_29 [1] : vector<16x32xf32> to vector<16xf32>
    %45 = vector.shape_cast %44 : vector<16xf32> to vector<16x1xf32>
    %c0_30 = arith.constant 0 : index
    %c0_31 = arith.constant 0 : index
    %46 = vector.load %arg10[%c0_30, %c0_31] : memref<1x32xf32, #tpu.memory_space<vmem>>, vector<1x32xf32>
    %47 = vector.broadcast %46 : vector<1x32xf32> to vector<16x32xf32>
    %48 = arith.mulf %22, %47 : vector<16x32xf32>
    %cst_32 = arith.constant dense<0.000000e+00> : vector<16xf32>
    %49 = vector.multi_reduction <add>, %48, %cst_32 [1] : vector<16x32xf32> to vector<16xf32>
    %50 = vector.shape_cast %49 : vector<16xf32> to vector<16x1xf32>
    %51 = arith.addf %45, %50 : vector<16x1xf32>
    %c0_33 = arith.constant 0 : index
    %c0_34 = arith.constant 0 : index
    %52 = vector.load %arg11[%c0_33, %c0_34] : memref<1x64xf32, #tpu.memory_space<vmem>>, vector<1x64xf32>
    %53 = vector.broadcast %52 : vector<1x64xf32> to vector<16x64xf32>
    %54 = arith.mulf %40, %53 : vector<16x64xf32>
    %cst_35 = arith.constant dense<0.000000e+00> : vector<16xf32>
    %55 = vector.multi_reduction <add>, %54, %cst_35 [1] : vector<16x64xf32> to vector<16xf32>
    %56 = vector.shape_cast %55 : vector<16xf32> to vector<16x1xf32>
    %57 = arith.addf %51, %56 : vector<16x1xf32>
    %c0_36 = arith.constant 0 : index
    %c0_37 = arith.constant 0 : index
    %58 = vector.load %arg12[%c0_36, %c0_37] : memref<1x1xf32, #tpu.memory_space<vmem>>, vector<1x1xf32>
    %59 = vector.broadcast %58 : vector<1x1xf32> to vector<16x1xf32>
    %60 = arith.addf %57, %59 : vector<16x1xf32>
    %c0_38 = arith.constant 0 : index
    %c0_39 = arith.constant 0 : index
    %61 = vector.load %arg13[%c0_38, %c0_39] : memref<16x1xf32, #tpu.memory_space<vmem>>, vector<16x1xf32>
    tpu.vector_store %arg13[%c0_38, %c0_39], %60 {strides = array<i32>} : memref<16x1xf32, #tpu.memory_space<vmem>>, vector<16x1xf32>,
    return
  }
  func.func @transform_0(%arg0: i32) -> (i32, i32) {
    %c0_i32 = arith.constant 0 : i32
    %c0_i32_0 = arith.constant 0 : i32
    return %arg0, %c0_i32 : i32, i32
  }
  func.func @transform_1(%arg0: i32) -> (i32, i32) {
    %c0_i32 = arith.constant 0 : i32
    %c0_i32_0 = arith.constant 0 : i32
    %c0_i32_1 = arith.constant 0 : i32
    return %c0_i32, %c0_i32_0 : i32, i32
  }
  func.func @transform_2(%arg0: i32) -> (i32, i32) {
    %c0_i32 = arith.constant 0 : i32
    %c0_i32_0 = arith.constant 0 : i32
    %c0_i32_1 = arith.constant 0 : i32
    return %c0_i32, %c0_i32_0 : i32, i32
  }
  func.func @transform_3(%arg0: i32) -> (i32, i32) {
    %c0_i32 = arith.constant 0 : i32
    %c0_i32_0 = arith.constant 0 : i32
    %c0_i32_1 = arith.constant 0 : i32
    return %c0_i32, %c0_i32_0 : i32, i32
  }
  func.func @transform_4(%arg0: i32) -> (i32, i32) {
    %c0_i32 = arith.constant 0 : i32
    %c0_i32_0 = arith.constant 0 : i32
    %c0_i32_1 = arith.constant 0 : i32
    return %c0_i32, %c0_i32_0 : i32, i32
  }
  func.func @transform_5(%arg0: i32) -> (i32, i32) {
    %c0_i32 = arith.constant 0 : i32
    %c0_i32_0 = arith.constant 0 : i32
    %c0_i32_1 = arith.constant 0 : i32
    return %c0_i32, %c0_i32_0 : i32, i32
  }
  func.func @transform_6(%arg0: i32) -> (i32, i32) {
    %c0_i32 = arith.constant 0 : i32
    %c0_i32_0 = arith.constant 0 : i32
    %c0_i32_1 = arith.constant 0 : i32
    return %c0_i32, %c0_i32_0 : i32, i32
  }
  func.func @transform_7(%arg0: i32) -> (i32, i32) {
    %c0_i32 = arith.constant 0 : i32
    %c0_i32_0 = arith.constant 0 : i32
    %c0_i32_1 = arith.constant 0 : i32
    return %c0_i32, %c0_i32_0 : i32, i32
  }
  func.func @transform_8(%arg0: i32) -> (i32, i32) {
    %c0_i32 = arith.constant 0 : i32
    %c0_i32_0 = arith.constant 0 : i32
    %c0_i32_1 = arith.constant 0 : i32
    return %c0_i32, %c0_i32_0 : i32, i32
  }
  func.func @transform_9(%arg0: i32) -> (i32, i32) {
    %c0_i32 = arith.constant 0 : i32
    %c0_i32_0 = arith.constant 0 : i32
    %c0_i32_1 = arith.constant 0 : i32
    return %c0_i32, %c0_i32_0 : i32, i32
  }
  func.func @transform_10(%arg0: i32) -> (i32, i32) {
    %c0_i32 = arith.constant 0 : i32
    %c0_i32_0 = arith.constant 0 : i32
    %c0_i32_1 = arith.constant 0 : i32
    return %c0_i32, %c0_i32_0 : i32, i32
  }
  func.func @transform_11(%arg0: i32) -> (i32, i32) {
    %c0_i32 = arith.constant 0 : i32
    %c0_i32_0 = arith.constant 0 : i32
    %c0_i32_1 = arith.constant 0 : i32
    return %c0_i32, %c0_i32_0 : i32, i32
  }
  func.func @transform_12(%arg0: i32) -> (i32, i32) {
    %c0_i32 = arith.constant 0 : i32
    %c0_i32_0 = arith.constant 0 : i32
    return %arg0, %c0_i32 : i32, i32
  }
}

</mosaic_0001>

<bundles_post_ra>
// kernel: tpu_custom_call.1
= control target key start
LH: loop header
LB: loop body
LE: loop exit
PB: predicated region body
PF: predicated region fallthrough
CT: control target
= control target key end

     0   :  { %s1190_s0 = inlined_call_operand.vmem [shape: bf16[32,24], index: 0, kind: input, shape index: {}]   ;;  %s1191_s1 = inlined_call_operand.hbm [shape: bf16[24,32], index: 1, kind: input, shape index: {}]   ;;  %s1192_s2 = inlined_call_operand.vmem [shape: f32[1,32], index: 2, kind: input, shape index: {}]   ;;  %s1193_s3 = inlined_call_operand.vmem [shape: bf16[32,32], index: 3, kind: input, shape index: {}]   ;;  %s1194_s4 = inlined_call_operand.vmem [shape: f32[1,32], index: 4, kind: input, shape index: {}]   ;;  %s1195_s5 = inlined_call_operand.vmem [shape: bf16[32,64], index: 5, kind: input, shape index: {}]   ;;  %s1196_s6 = inlined_call_operand.vmem [shape: bf16[32,64], index: 6, kind: input, shape index: {}]   ;;  %s1197_s7 = inlined_call_operand.vmem [shape: f32[1,64], index: 7, kind: input, shape index: {}]   ;;  %s1198_s8 = inlined_call_operand.vmem [shape: f32[1,32], index: 8, kind: input, shape index: {}]   ;;  %s1199_s9 = inlined_call_operand.vmem [shape: f32[1,32], index: 9, kind: input, shape index: {}]   ;;  %s1200_s10 = inlined_call_operand.vmem [shape: f32[1,64], index: 10, kind: input, shape index: {}]   ;;  %s1201_s11 = inlined_call_operand.<no memory space> [shape: f32[1,1], index: 11, kind: input, shape index: {}]   ;;  %s1202_s12 = inlined_call_operand.vmem [shape: f32[32,1], index: 12, kind: output, shape index: {}]  }
   0x1   :  { %v17_v0 = vstv %s1201_s11 }
   0x2   :  { %18 = vst [vmem:[#allocation2] sm:$0x1] %v17_v0 }
   0x3   :  { %19 = vsyncpa [#allocation4], 0  ;;  %s1080_s23 = smov 0  }
   0x4 LB: > { %s858_s24 = sadd.s32 4294967295, %s1005_s23   ;;  %p860_p0 = scmp.ge.s32.totalorder %s1005_s23, 1  ;;  %s1005_s23 = sphi %s1080_s23, %s25_s23  }
   0x5   : > { %p313_p1 = scmp.lt.s32.totalorder %s1005_s23, 3  ;;  %s1007_s25 = smov [#allocation3]  }
   0x6   : > { %s325_s26 = sshll.u32 %s1007_s25, 4  ;;  %p1094_p3 = scmp.eq.s32.totalorder %s858_s24, 0  ;;  %s326_s26 = int_to_ptr.vmem [resolvable:$true] %s325_s26 }
   0x7   : > { %p1088_p2 = pnand %p860_p0, %p313_p1  ;;  %s967_s13 = scalar_lea.hbm %s1191_s1, 192 }
   0x8   : > { %s1207_s27 = scalar_select %p1094_p3, 1, 0 }
   0x9   : > { %s1206_s11 = scalar_select %p1088_p2, 1, 0 }
   0xa   : > { %p939_p4 = pneg %p1088_p2  ;;  %p968_p6 = scmp.ne.s32.totalorder %s1191_s1, %s967_s13 }
   0xb   : > { %p974_p10 = scmp.lt.u32.totalorder %s967_s13, %s1191_s1 }
   0xc   : > { %p1102_p5 = pnand %p1094_p3, %p939_p4 }
   0xe   : > { %p969_p7 = pneg %p1102_p5 }
  0x10   : > { %p970_p8 = pnand %p969_p7, %p968_p6 }
  0x12   : > { %p971_p9 = pneg %p970_p8 }
  0x14   : > { %p976_p11 = pnand %p974_p10, %p971_p9 }
  0x16   : > { %979 = shalt.err (!%p976_p11)
}
  0x17   : > { %s980_s18 = scalar_lea.vmem %s326_s26, 192  ;;  %p988_p1 = scmp.lt.s32.totalorder %s326_s26, %s326_s26 }
  0x18   : > { %p981_p12 = scmp.ne.s32.totalorder %s326_s26, %s980_s18  ;;  %p989_p4 = scmp.lt.s32.totalorder %s980_s18, %s980_s18 }
  0x1a   : > { %p983_p13 = pnand %p981_p12, %p969_p7  ;;  %p990_p3 = por %p989_p4, %p988_p1 }
  0x1c   : > { %p984_p0 = pneg %p983_p13 }
  0x1e   : > { %p991_p2 = pnand %p990_p3, %p984_p0 }
  0x20   : > { %994 = shalt.err (!%p991_p2)
}
  0x21   : > { %s1008_s19 = smov 64   ;;  %s1009_s20 = smov 4  }
  0x22   : > { %942 = dma.hbm_to_vmem [thread:$0]  (!%p1102_p5), %s1191_s1, 192, %s326_s26, [#allocation4], %s1008_s19, %s1008_s19, %s1009_s20  }
  0x23   : > { %p1209_p6 = scmp.ne.s32.totalorder %s1206_s11, 0 }
  0x24   : > { %p1210_p8 = scmp.ne.s32.totalorder (!%p1209_p6), %s1207_s27, 0 }
  0x25   : > { %380 = sbr.rel (%p1209_p6) target bundleno = 881 (0x371), region = 68 }
  0x2c   : > { %1000 = dma.done.wait (%p1210_p8), [#allocation4], 192  }
  0x2d   : > { %1002 = vsyncadd (%p1210_p8), [#allocation4], 4294967104  ;;  %s865_s25 = sshll.u32 %s858_s24, 1  ;;  %v1010_v1 = vmov 0.0   ;;  %vm1011_vm0 = vmmov 0   ;;  %v958_v2 = vld [vmem:[#allocation3] sm:$0xff]  }
  0x2e   : > { %903 = vmatprep.subr.bf16.mxu0 %v1010_v1  ;;  %907 = vmatprep.mubr.msk.bf16.mxu0 %vm1011_vm0, %v1010_v1  ;;  %p423_p2 = scmp.lt.s32.totalorder %s865_s25, 3  ;;  %vm465_vm1 = vcmask 1043456   ;;  %v959_v3 = vld [vmem:[#allocation3 + $0x8] ss:$0 sps:$4 sm:$0xff]   ;;  %vm461_vm2 = vcmask 195584   ;;  %v961_v6 = vld [vmem:[%s1193_s3] sm:$0xff]  }
  0x2f   : > { %911 = vmatprep.subr.bf16.mxu1 %v1010_v1  ;;  %915 = vmatprep.mubr.msk.bf16.mxu1 %vm1011_vm0, %v1010_v1  ;;  %v467_v4 = vsel %vm465_vm1, %v959_v3, 0  ;;  %v962_v7 = vld [vmem:[%s1193_s3 + $0x8] sm:$0xff]   ;;  %v869_v8 = vld [vmem:[%s1192_s2] ss:$0 sm:$0xff]  ;;  %vm536_vm3 = vcmask 261120   ;;  %vm769_vm4 = vcmask 523264  }
  0x30   : > { %s1212_s25 = smov (!%p423_p2, %s865_s25), 3  ;;  %904 = vmatpush3.bf16.msra.mxu0 %v958_v2  ;;  %912 = vmatpush3.bf16.msra.mxu1 %v961_v6  ;;  %v885_v13 = vld [vmem:[%s1198_s8] ss:$0 sm:$0xff]  ;;  %v964_v24 = vld [vmem:[%s1195_s5 + $0x8] sm:$0xff]   ;;  %vm787_vm5 = vcmask 7168  }
  0x31   : > { %s866_s26 = sshll.u32 %s1212_s25, 2  ;;  %905 = vmatprep.subr.bf16.mxu0 %v1010_v1  ;;  %913 = vmatprep.subr.bf16.mxu1 %v1010_v1  ;;  %v963_v19 = vld [vmem:[%s1195_s5] sm:$0xff]   ;;  %v966_v26 = vld [vmem:[%s1196_s6 + $0x8] sm:$0xff]   ;;  %s868_s17 = sshll.u32 %s1212_s25, 3 }
  0x32   : > { %s426_s28 = scalar_lea.vmem %s1190_s0, %s866_s26  ;;  %v965_v25 = vld [vmem:[%s1196_s6] sm:$0xff]   ;;  %s432_s20 = scalar_lea.vmem %s1202_s12, %s868_s17 }
  0x33   : > { %v960_v5 = vld [vmem:[%s426_s28] sm:$0xff]  }
  0x34   : > { %906 = vmatpush3.bf16.msra.mxu0 %v467_v4  ;;  %914 = vmatpush3.bf16.msra.mxu1 %v962_v7  ;;  %v874_v27 = vld [vmem:[%s1194_s4] ss:$0 sm:$0xff] }
  0x35   : > { %919 = vmatprep.subr.bf16.mxu0 %v1010_v1  ;;  %927 = vmatprep.subr.bf16.mxu1 %v1010_v1  ;;  %v886_v44 = vld [vmem:[%s1199_s9] ss:$0 sm:$0xff] }
  0x36   : > { %v884_v55 = vld [vmem:[%s1197_s7] ss:$0 sm:$0xff] }
  0x37   : > { %908 = vmatmul.mubr.msk.bf16.vlgmr.msra.gmra.mrb[0].mxu0 %vm461_vm2, %v960_v5  ;;  %v887_v6 = vld [vmem:[%s1200_s10] ss:$0 sm:$0xff] }
  0x38   : > { %923 = vmatprep.mubr.msk.bf16.mxu0 %vm1011_vm0, %v1010_v1  ;;  %920 = vmatpush3.bf16.msra.mxu0 %v965_v25 }
  0x39   : > { %921 = vmatprep.subr.bf16.mxu0 %v1010_v1 }
  0x3c   : > { %922 = vmatpush3.bf16.msra.mxu0 %v966_v26 }
 0x10a   : > { %v503_v9 = vpop.f32.mrb[0].mxu0 }
 0x10b   : > { %v504_v10 = vadd.f32 %v869_v8, %v503_v9  ;;  %v909_v11 = vpop.f32.mrb[1].mxu0 }
 0x10c   : > { %v506_v12 = vpop.f32.mrb[2].mxu0 }
 0x10d   : > { %v510_v14 = vmax.f32 %v504_v10, 0.0  ;;  %v507_v15 = vadd.f32 %v869_v8, %v506_v12  ;;  %v910_v16 = vpop.f32.mrb[3].mxu0 }
 0x10f   : > { %v511_v17 = vmax.f32 %v507_v15, 0.0  ;;  %v735_v18 = vmul.f32 %v885_v13, %v510_v14 }
 0x111   : > { %v512_v20 = vpack.c.bf16 %v511_v17, %v510_v14  ;;  %v737_v21 = vsel %vm536_vm3, %v735_v18, 0.0  ;;  %v736_v22 = vmul.f32 %v885_v13, %v511_v17 }
 0x112   : > { %738 = vadd.xlane.f32.xlu0 %v737_v21 }
 0x113   : > { %916 = vmatmul.mubr.msk.bf16.vlgmr.msra.gmra.mrb[0].mxu1 %vm536_vm3, %v512_v20  ;;  %v740_v23 = vsel %vm536_vm3, %v736_v22, 0.0 }
 0x114   : > { %741 = vadd.xlane.f32.xlu1 %v740_v23  ;;  %928 = vmatpush3.bf16.msra.mxu1 %v963_v19  ;;  %v888_v19 = vld [vmem:[#allocation2] ss:$0 sm:$0xff] }
 0x115   : > { %929 = vmatprep.subr.bf16.mxu1 %v1010_v1  ;;  %931 = vmatprep.mubr.msk.bf16.mxu1 %vm1011_vm0, %v1010_v1 }
 0x118   : > { %930 = vmatpush3.bf16.msra.mxu1 %v964_v24 }
 0x11b   : > { %932 = vmatmul.mubr.msk.bf16.vlgmr.msra.gmra.mrb[4].mxu1 %vm536_vm3, %v512_v20 }
 0x19f   : > { %v739_v14 = vpop.xlane.xlu0 %738 }
 0x1a1   : > { %v742_v15 = vpop.xlane.xlu1 %741 }
 0x1e6   : > { %v574_v28 = vpop.f32.mrb[0].mxu1 }
 0x1e7   : > { %v575_v29 = vadd.f32 %v874_v27, %v574_v28  ;;  %v917_v30 = vpop.f32.mrb[1].mxu1 }
 0x1e8   : > { %v577_v31 = vpop.f32.mrb[2].mxu1 }
 0x1e9   : > { %v581_v32 = vadd.f32 3.0, %v575_v29  ;;  %v578_v33 = vadd.f32 %v874_v27, %v577_v31  ;;  %v918_v34 = vpop.f32.mrb[3].mxu1 }
 0x1eb   : > { %v583_v35 = vmax.f32 %v581_v32, 0.0  ;;  %v582_v36 = vadd.f32 3.0, %v578_v33 }
 0x1ed   : > { %v585_v37 = vmin.f32 %v583_v35, 6.0  ;;  %v584_v38 = vmax.f32 %v582_v36, 0.0 }
 0x1ee   : > { %v702_v39 = vpop.f32.mrb[4].mxu1 }
 0x1ef   : > { %v587_v40 = vmul.f32 0.16666667, %v585_v37  ;;  %v586_v41 = vmin.f32 %v584_v38, 6.0  ;;  %v933_v42 = vpop.f32.mrb[5].mxu1 }
 0x1f0   : > { %v705_v43 = vpop.f32.mrb[6].mxu1 }
 0x1f1   : > { %v589_v45 = vmul.f32 %v587_v40, %v575_v29  ;;  %v588_v46 = vmul.f32 0.16666667, %v586_v41  ;;  %v934_v47 = vpop.f32.mrb[7].mxu1 }
 0x1f3   : > { %v590_v48 = vmul.f32 %v588_v46, %v578_v33  ;;  %v750_v49 = vmul.f32 %v886_v44, %v589_v45 }
 0x1f5   : > { %v591_v50 = vpack.c.bf16 %v590_v48, %v589_v45  ;;  %v752_v51 = vsel %vm536_vm3, %v750_v49, 0.0  ;;  %v751_v52 = vmul.f32 %v886_v44, %v590_v48 }
 0x1f6   : > { %753 = vadd.xlane.f32.xlu0 %v752_v51 }
 0x1f7   : > { %924 = vmatmul.mubr.msk.bf16.vlgmr.msra.gmra.mrb[4].mxu0 %vm536_vm3, %v591_v50  ;;  %v755_v53 = vsel %vm536_vm3, %v751_v52, 0.0 }
 0x1f8   : > { %756 = vadd.xlane.f32.xlu1 %v755_v53 }
 0x283   : > { %v754_v16 = vpop.xlane.xlu0 %753 }
 0x284   : > { %v758_v18 = vadd.f32 %v754_v16, %v739_v14 }
 0x285   : > { %v757_v17 = vpop.xlane.xlu1 %756 }
 0x286   : > { %v759_v21 = vadd.f32 %v757_v17, %v742_v15 }
 0x2ca   : > { %v649_v54 = vpop.f32.mrb[4].mxu0 }
 0x2cb   : > { %v703_v56 = vadd.f32 %v702_v39, %v649_v54  ;;  %v925_v57 = vpop.f32.mrb[5].mxu0 }
 0x2cc   : > { %v652_v58 = vpop.f32.mrb[6].mxu0 }
 0x2cd   : > { %v716_v59 = vadd.f32 %v884_v55, %v703_v56  ;;  %v706_v60 = vadd.f32 %v705_v43, %v652_v58  ;;  %v926_v61 = vpop.f32.mrb[7].mxu0 }
 0x2cf   : > { %v718_v62 = vadd.f32 3.0, %v716_v59  ;;  %v717_v63 = vadd.f32 %v884_v55, %v706_v60 }
 0x2d1   : > { %v720_v0 = vmax.f32 %v718_v62, 0.0  ;;  %v719_v1 = vadd.f32 3.0, %v717_v63 }
 0x2d3   : > { %v722_v2 = vmin.f32 %v720_v0, 6.0  ;;  %v721_v3 = vmax.f32 %v719_v1, 0.0 }
 0x2d5   : > { %v724_v4 = vmul.f32 0.16666667, %v722_v2  ;;  %v723_v5 = vmin.f32 %v721_v3, 6.0 }
 0x2d7   : > { %v725_v7 = vmul.f32 0.16666667, %v723_v5  ;;  %v726_v8 = vmul.f32 %v724_v4, %v716_v59 }
 0x2d9   : > { %v767_v9 = vmul.f32 %v887_v6, %v726_v8  ;;  %v727_v10 = vmul.f32 %v725_v7, %v717_v63 }
 0x2db   : > { %v770_v11 = vsel %vm769_vm4, %v767_v9, 0.0  ;;  %v768_v12 = vmul.f32 %v887_v6, %v727_v10 }
 0x2dc   : > { %771 = vadd.xlane.f32.xlu0 %v770_v11 }
 0x2dd   : > { %v773_v13 = vsel %vm769_vm4, %v768_v12, 0.0 }
 0x2de   : > { %774 = vadd.xlane.f32.xlu1 %v773_v13 }
 0x369   : > { %v772_v20 = vpop.xlane.xlu0 %771 }
 0x36a   : > { %v776_v22 = vadd.f32 %v772_v20, %v758_v18 }
 0x36b   : > { %v775_v23 = vpop.xlane.xlu1 %774 }
 0x36c   : > { %v785_v24 = vadd.f32 %v888_v19, %v776_v22  ;;  %v777_v25 = vadd.f32 %v775_v23, %v759_v21 }
 0x36e   : > { %788 = vst.msk [vmem:[%s432_s20] sm:$0xff] %vm787_vm5, %v785_v24  ;;  %v786_v26 = vadd.f32 %v888_v19, %v777_v25 }
 0x370   : > { %789 = vst.msk [vmem:[%s432_s20 + $0x8] sm:$0xff] %vm787_vm5, %v786_v26 }
 0x371 PF: > { %s25_s23 = sadd.s32 1, %s1005_s23  }
 0x372   : > { %p22_p3 = scmp.ge.s32.totalorder %s25_s23, 4  }
 0x374   :  { %24 = sbr.rel (!%p22_p3) target bundleno = 4 (0x4), region = 103 }
 0x37b   :  { %812 = vsyncpa [#allocation4], 1 }
 0x37c   :  { %814 = vsyncpa [#allocation4 + $0x1], 1 }

</bundles_post_ra>
